<compile_context>
chip_gen: v6e
topology: v6e:2x2x1
jax: 0.10.0
libtpu: 0.0.40
codegen_flags: <defaults>
</compile_context>

<pallas_src>
import functools
import math

import jax
import jax.numpy as jnp
import numpy as np
from jax import lax
from jax.experimental import pallas as pl
from jax.experimental.pallas import tpu as pltpu

SMOOTH = 9.0   # module's `labmda` (smooth=9); no learned parameters in this module
EPS = 1e-8


def _round_up(x, m):
    return ((x + m - 1) // m) * m


def _vmem_limit_bytes():
    """Generation-aware scoped-VMEM budget: ~7/8 of physical VMEM, capped at
    100 MiB.  v5e/v6e (128 MiB physical) -> 100 MiB; v7x (64 MiB) -> 56 MiB."""
    cap = 64 * 1024 * 1024
    try:
        cap = int(pltpu.get_tpu_info().vmem_capacity_bytes)
    except Exception:
        pass
    return int(min(cap - cap // 8, 100 * 1024 * 1024))


def _pick_caption_tile(n_caption, w_pad, target_tw, max_tw=2048):
    """Captions per grid step: make the flattened caption*word lane axis close
    to `target_tw` and (when cheap) a multiple of 128 for lane-dense MXU tiles."""
    step = 128 // math.gcd(w_pad, 128)            # captions per 128-lane unit
    if step * w_pad <= max_tw:
        tile = step * max(1, target_tw // (step * w_pad))
    else:
        tile = max(1, target_tw // w_pad)
    # don't tile far past the (step-aligned) caption count
    return max(1, min(tile, _round_up(max(n_caption, 1), step)))


def _pick_image_tile(n_image, r_pad, d, tw, budget_bytes):
    """Images per grid step, bounded so the per-step f32 temporaries
    (raw/attn/e/p/gp) plus the resident imgs/gram blocks fit the budget."""
    per_img = r_pad * (6 * tw + d + r_pad) * 4
    t = max(1, int(budget_bytes // max(per_img, 1)))
    if t >= n_image:
        return n_image
    return max(8, (t // 8) * 8)


def _t2i_kernel(img_ref, gram_ref, cap_ref, seg2_ref, cwsq_ref, invc_ref,
                out_ref, *, n_regions):
    imgs = img_ref[...]                     # (tn, Rp, D)   native dtype
    gram = gram_ref[...]                    # (tn, Rp, Rp)  f32, imgs @ imgs^T
    caps = cap_ref[...]                     # (tc, Wp, D)   padded words zeroed
    seg2 = seg2_ref[...]                    # (TW, tc)      f32 word -> caption map
    c2 = cwsq_ref[0]                        # (1, TW)       f32 per-word |cap|^2
    invc = invc_ref[0]                      # (1, tc)       f32 1 / max(n_word, 1)

    tn, rp, d = imgs.shape
    tc, wp, _ = caps.shape
    tw = tc * wp

    imgs2 = imgs.reshape(tn * rp, d)        # free: rp % 8 == 0
    caps2 = caps.reshape(tw, d)             # free: wp % 8 == 0

    # ---- MXU 1: raw attention logits, lane-dense over caption*word -----------
    raw = lax.dot_general(imgs2, caps2, (((1,), (1,)), ((), ())),
                          preferred_element_type=jnp.float32)        # (tn*rp, tw)
    attn = jnp.maximum(raw, 0.1 * raw)                                # LeakyReLU(0.1)

    # ---- l2-norm over the words of each caption -------------------------------
    # segmented lane reduction as two skinny MXU matmuls against the (tw, tc) map
    ssq_cap = jnp.dot(attn * attn, seg2,
                      preferred_element_type=jnp.float32)             # (tn*rp, tc)
    ssq = lax.dot_general(ssq_cap, seg2, (((1,), (1,)), ((), ())),
                          preferred_element_type=jnp.float32)         # (tn*rp, tw)
    attn = attn * lax.rsqrt(jnp.maximum(ssq, EPS * EPS))              # EUP rsqrt

    # ---- softmax over regions (temperature SMOOTH) ----------------------------
    a3 = attn.reshape(tn, rp, tw)            # free: rp % 8 == 0
    # |attn| <= 1 after the l2norm, so logits are bounded by +-SMOOTH: the usual
    # max-shift is unnecessary in f32.
    e = jnp.exp(SMOOTH * a3)
    if rp > n_regions:                       # exclude zero-padded regions
        rmask = (lax.broadcasted_iota(jnp.int32, (rp, 1), 0)
                 < n_regions).astype(jnp.float32)
        e = e * rmask
    denom = jnp.sum(e, axis=1, keepdims=True)                         # (tn, 1, tw)
    # approx reciprocal on the EUP; its per-(image, word) scale error cancels
    # exactly in the scale-invariant cosine below.
    p = e * pl.reciprocal(denom, approx=True)                         # (tn, rp, tw)

    # ---- cosine(word, weighted context) without materializing the context -----
    #   num      = cap . wctx = sum_r p * raw        (reuses the MXU-1 output)
    #   |wctx|^2 = sum_r p * (G @ p)                 (per-image Gram matrix)
    raw3 = raw.reshape(tn, rp, tw)
    num = jnp.sum(p * raw3, axis=1)                                   # (tn, tw)
    gp = jnp.einsum("nrs,nsx->nrx", gram, p,
                    preferred_element_type=jnp.float32)               # MXU, (tn, rp, tw)
    w2 = jnp.sum(p * gp, axis=1)                                      # (tn, tw)
    # padded words / padded captions have num == 0 and c2 == 0 -> cos == 0
    cos = num * lax.rsqrt(jnp.maximum(c2 * w2, EPS * EPS))            # (tn, tw)

    # ---- mean over the valid words of each caption (MXU segmented sum) --------
    sums = jnp.dot(cos, seg2, preferred_element_type=jnp.float32)     # (tn, tc)
    out_ref[0, 0, :, :] = sums * invc                                 # lane-major block


def t2i_cross_attention_pool(imgs, caps, img_lens, cap_lens, *,
                             tile_c=None, tile_n=None):
    """Forward pass of T2ICrossAttentionPool -> (n_image, n_caption) similarities.
    `img_lens` is unused, exactly as in the PyTorch module."""
    del img_lens
    n, r, d = imgs.shape
    c, w, _ = caps.shape

    vmem_limit = _vmem_limit_bytes()

    # Pad word / region axes to sublane multiples (layout-free kernel reshapes);
    # zero-pad so padded entries drop out of the math.
    wp = _round_up(w, 8)
    rp = _round_up(r, 8)
    imgs_p = jnp.pad(imgs, ((0, 0), (0, rp - r), (0, 0)))
    caps_p = jnp.pad(caps, ((0, 0), (0, wp - w), (0, 0)))
    # zero padded caption words host-side (replaces the in-kernel word mask)
    word_mask = (jnp.arange(wp, dtype=jnp.int32)[None, :]
                 < cap_lens.astype(jnp.int32)[:, None])
    caps_p = caps_p * word_mask.astype(caps_p.dtype)[:, :, None]

    if tile_c is None:
        target_tw = 512 if vmem_limit >= 96 * 1024 * 1024 else 256
        tile_c = _pick_caption_tile(c, wp, target_tw)
    n_ct = pl.cdiv(c, tile_c)
    c_pad = n_ct * tile_c
    tw = tile_c * wp

    if tile_n is None:
        tile_n = _pick_image_tile(n, rp, d, tw, vmem_limit // 3)
    n_it = pl.cdiv(n, tile_n)
    n_pad = n_it * tile_n

    if c_pad != c:
        caps_p = jnp.pad(caps_p, ((0, c_pad - c), (0, 0), (0, 0)))
    if n_pad != n:
        imgs_p = jnp.pad(imgs_p, ((0, n_pad - n), (0, 0), (0, 0)))

    # ---- grid-invariant constants, hoisted out of the kernel body -------------
    # word -> caption segment map (identical for every caption tile, DMA'd once)
    seg2 = jnp.repeat(jnp.eye(tile_c, dtype=jnp.float32), wp, axis=0)  # (tw, tile_c)
    # per-word squared caption norms (padded words are zero)
    cwsq = jnp.sum(jnp.square(caps_p.astype(jnp.float32)),
                   axis=-1).reshape(n_ct, 1, tw)
    # 1 / n_word per caption (padded captions -> 1; their columns are sliced off)
    cnt = jnp.maximum(cap_lens.astype(jnp.float32), 1.0)
    cnt = jnp.pad(cnt, (0, c_pad - c), constant_values=1.0)
    invc = (1.0 / cnt).reshape(n_ct, 1, tile_c)
    # per-image Gram matrix: one host-side GEMM that lets the kernel skip the
    # K=R weighted-context matmul and the (n, tw, d) cosine chain entirely
    gram = jnp.einsum("nrd,nsd->nrs", imgs_p, imgs_p,
                      preferred_element_type=jnp.float32).astype(jnp.float32)

    kernel = functools.partial(_t2i_kernel, n_regions=r)

    out = pl.pallas_call(
        kernel,
        out_shape=jax.ShapeDtypeStruct((n_it, n_ct, tile_n, tile_c), jnp.float32),
        grid=(n_it, n_ct),
        in_specs=[
            # image-tile-resident blocks (constant along the caption grid axis).
            # NOTE: single-buffering these (pipeline_mode=pl.Buffered(1)) would
            # halve their VMEM footprint; left default-buffered for portability.
            pl.BlockSpec((tile_n, rp, d), lambda i, j: (i, 0, 0)),
            pl.BlockSpec((tile_n, rp, rp), lambda i, j: (i, 0, 0)),
            # caption-tile blocks
            pl.BlockSpec((tile_c, wp, d), lambda i, j: (j, 0, 0)),
            # grid-invariant segment map (DMA'd once)
            pl.BlockSpec((tw, tile_c), lambda i, j: (0, 0)),
            pl.BlockSpec((1, 1, tw), lambda i, j: (j, 0, 0)),
            pl.BlockSpec((1, 1, tile_c), lambda i, j: (j, 0, 0)),
        ],
        out_specs=pl.BlockSpec((1, 1, tile_n, tile_c), lambda i, j: (i, j, 0, 0)),
        compiler_params=pltpu.CompilerParams(
            dimension_semantics=("parallel", "parallel"),
            vmem_limit_bytes=vmem_limit),
    )(imgs_p, gram, caps_p, seg2, cwsq, invc)

    out = out.transpose(0, 2, 1, 3).reshape(n_pad, c_pad)
    return out[:n, :c]


def _reference(imgs, caps, cap_lens, smooth=SMOOTH, eps=EPS):
    """Pure numpy mirror of the PyTorch forward (caption loop with slicing)."""
    imgs = np.asarray(imgs, np.float32)
    caps = np.asarray(caps, np.float32)
    N, C = imgs.shape[0], caps.shape[0]
    sims = np.zeros((N, C), np.float32)
    for i in range(C):
        n_word = int(cap_lens[i])
        cap_i = caps[i, :n_word, :]                                # (w, d)
        attn = np.einsum("nrd,wd->nrw", imgs, cap_i)
        attn = np.where(attn > 0, attn, 0.1 * attn)
        attn = attn / (np.sqrt((attn ** 2).sum(-1, keepdims=True)) + eps)
        attn = np.transpose(attn, (0, 2, 1)) * smooth
        attn = attn - attn.max(-1, keepdims=True)
        e = np.exp(attn)
        attn = e / e.sum(-1, keepdims=True)
        wctx = np.einsum("nwr,nrd->nwd", attn, imgs)
        wctx = wctx / (np.sqrt((wctx ** 2).sum(-1, keepdims=True)) + eps)
        capb = cap_i[None]
        num = (capb * wctx).sum(-1)
        den = np.maximum(np.sqrt((capb ** 2).sum(-1)) * np.sqrt((wctx ** 2).sum(-1)), eps)
        sims[:, i] = (num / den).mean(-1)
    return sims


if __name__ == "__main__":
    key = jax.random.PRNGKey(0)
    k1, k2 = jax.random.split(key)

    n_image, n_regions, d = 2, 16, 32
    n_caption, max_n_word = 20, 16

    imgs = jax.random.normal(k1, (n_image, n_regions, d), dtype=jnp.float32)
    caps = jax.random.normal(k2, (n_caption, max_n_word, d), dtype=jnp.float32)
    cap_lens = (jnp.arange(n_caption, dtype=jnp.int32) % (max_n_word - 2)) + 3
    img_lens = jnp.full((n_image,), n_regions, dtype=jnp.int32)   # unused, as in torch

    ref = _reference(np.asarray(imgs), np.asarray(caps), np.asarray(cap_lens))

    # default, device-derived tiling
    out = t2i_cross_attention_pool(imgs, caps, img_lens, cap_lens)
    out = jax.block_until_ready(out)
    assert out.shape == (n_image, n_caption), out.shape
    max_err = np.abs(np.asarray(out) - ref).max()
    assert np.allclose(np.asarray(out), ref, atol=2e-3, rtol=2e-3), max_err

    # forced small tiles: exercises the multi-tile caption grid + padding paths
    out2 = t2i_cross_attention_pool(imgs, caps, img_lens, cap_lens,
                                    tile_c=8, tile_n=2)
    out2 = jax.block_until_ready(out2)
    max_err2 = np.abs(np.asarray(out2) - ref).max()
    assert np.allclose(np.asarray(out2), ref, atol=2e-3, rtol=2e-3), max_err2

    print("KERNEL_OK")
</pallas_src>

<mosaic_0001>
module attributes {stable_mosaic.version = 11 : i64} {
  func.func @_t2i_kernel(%arg0: i32, %arg1: i32, %arg2: memref<2x16x32xf32, #tpu.memory_space<vmem>>, %arg3: memref<2x16x16xf32, #tpu.memory_space<vmem>>, %arg4: memref<16x16x32xf32, #tpu.memory_space<vmem>>, %arg5: memref<256x16xf32, #tpu.memory_space<vmem>>, %arg6: memref<1x1x256xf32, #tpu.memory_space<vmem>>, %arg7: memref<1x1x16xf32, #tpu.memory_space<vmem>>, %arg8: memref<1x1x2x16xf32, #tpu.memory_space<vmem>>) attributes {dimension_semantics = [#tpu.dimension_semantics<parallel>, #tpu.dimension_semantics<parallel>], iteration_bounds = array<i64: 1, 2>, scalar_prefetch = 0 : i64, scratch_operands = 0 : i64, tpu.core_type = #tpu.core_type<tc>, window_params = [{transform_indices = @transform_0, window_bounds = array<i64: 2, 16, 32>}, {transform_indices = @transform_1, window_bounds = array<i64: 2, 16, 16>}, {transform_indices = @transform_2, window_bounds = array<i64: 16, 16, 32>}, {pipeline_mode = #tpu.pipeline_mode<synchronous>, transform_indices = @transform_3, window_bounds = array<i64: 256, 16>}, {transform_indices = @transform_4, window_bounds = array<i64: 1, 1, 256>}, {transform_indices = @transform_5, window_bounds = array<i64: 1, 1, 16>}, {transform_indices = @transform_6, window_bounds = array<i64: 1, 1, 2, 16>}]} {
    %c0 = arith.constant 0 : index
    %c0_0 = arith.constant 0 : index
    %c0_1 = arith.constant 0 : index
    %0 = vector.load %arg2[%c0, %c0_0, %c0_1] : memref<2x16x32xf32, #tpu.memory_space<vmem>>, vector<2x16x32xf32>
    %c0_2 = arith.constant 0 : index
    %c0_3 = arith.constant 0 : index
    %c0_4 = arith.constant 0 : index
    %1 = vector.load %arg3[%c0_2, %c0_3, %c0_4] : memref<2x16x16xf32, #tpu.memory_space<vmem>>, vector<2x16x16xf32>
    %c0_5 = arith.constant 0 : index
    %c0_6 = arith.constant 0 : index
    %c0_7 = arith.constant 0 : index
    %2 = vector.load %arg4[%c0_5, %c0_6, %c0_7] : memref<16x16x32xf32, #tpu.memory_space<vmem>>, vector<16x16x32xf32>
    %c0_8 = arith.constant 0 : index
    %c0_9 = arith.constant 0 : index
    %3 = vector.load %arg5[%c0_8, %c0_9] : memref<256x16xf32, #tpu.memory_space<vmem>>, vector<256x16xf32>
    %c0_10 = arith.constant 0 : index
    %c0_11 = arith.constant 0 : index
    %c0_12 = arith.constant 0 : index
    %4 = vector.load %arg6[%c0_10, %c0_11, %c0_12] : memref<1x1x256xf32, #tpu.memory_space<vmem>>, vector<1x1x256xf32>
    %5 = vector.shape_cast %4 : vector<1x1x256xf32> to vector<1x256xf32>
    %c0_13 = arith.constant 0 : index
    %c0_14 = arith.constant 0 : index
    %c0_15 = arith.constant 0 : index
    %6 = vector.load %arg7[%c0_13, %c0_14, %c0_15] : memref<1x1x16xf32, #tpu.memory_space<vmem>>, vector<1x1x16xf32>
    %7 = vector.shape_cast %6 : vector<1x1x16xf32> to vector<1x16xf32>
    %8 = vector.shape_cast %0 : vector<2x16x32xf32> to vector<32x32xf32>
    %9 = vector.shape_cast %2 : vector<16x16x32xf32> to vector<256x32xf32>
    %cst = arith.constant dense<0.000000e+00> : vector<32x256xf32>
    %10 = tpu.matmul %8, %9, %cst {dimension_numbers = #tpu.dot_dimension_numbers<[1], [1], [0], [0], [0, 0, 1, 0], [], []>} : vector<32x32xf32>, vector<256x32xf32>, vector<32x256xf32> -> vector<32x256xf32>
    %cst_16 = arith.constant 1.000000e-01 : f32
    %11 = vector.broadcast %cst_16 : f32 to vector<32x256xf32>
    %12 = arith.mulf %11, %10 : vector<32x256xf32>
    %13 = arith.maximumf %10, %12 : vector<32x256xf32>
    %14 = arith.mulf %13, %13 : vector<32x256xf32>
    %cst_17 = arith.constant dense<0.000000e+00> : vector<32x16xf32>
    %15 = tpu.matmul %14, %3, %cst_17 {dimension_numbers = #tpu.dot_dimension_numbers<[1], [0], [0], [1], [0, 0, 1, 1], [], []>} : vector<32x256xf32>, vector<256x16xf32>, vector<32x16xf32> -> vector<32x16xf32>
    %cst_18 = arith.constant dense<0.000000e+00> : vector<32x256xf32>
    %16 = tpu.matmul %15, %3, %cst_18 {dimension_numbers = #tpu.dot_dimension_numbers<[1], [1], [0], [0], [0, 0, 1, 0], [], []>} : vector<32x16xf32>, vector<256x16xf32>, vector<32x256xf32> -> vector<32x256xf32>
    %cst_19 = arith.constant 1.000000e-16 : f32
    %17 = vector.broadcast %cst_19 : f32 to vector<32x256xf32>
    %18 = arith.maximumf %16, %17 : vector<32x256xf32>
    %19 = math.rsqrt %18 : vector<32x256xf32>
    %20 = arith.mulf %13, %19 : vector<32x256xf32>
    %21 = vector.shape_cast %20 : vector<32x256xf32> to vector<2x16x256xf32>
    %cst_20 = arith.constant 9.000000e+00 : f32
    %22 = vector.broadcast %cst_20 : f32 to vector<2x16x256xf32>
    %23 = arith.mulf %22, %21 : vector<2x16x256xf32>
    %24 = math.exp %23 : vector<2x16x256xf32>
    %cst_21 = arith.constant dense<0.000000e+00> : vector<2x256xf32>
    %25 = vector.multi_reduction <add>, %24, %cst_21 [1] : vector<2x16x256xf32> to vector<2x256xf32>
    %26 = vector.shape_cast %25 : vector<2x256xf32> to vector<2x1x256xf32>
    %27 = tpu.reciprocal %26 {approx = true} : vector<2x1x256xf32> -> vector<2x1x256xf32>
    %28 = vector.broadcast %27 : vector<2x1x256xf32> to vector<2x16x256xf32>
    %29 = arith.mulf %24, %28 : vector<2x16x256xf32>
    %30 = vector.shape_cast %10 : vector<32x256xf32> to vector<2x16x256xf32>
    %31 = arith.mulf %29, %30 : vector<2x16x256xf32>
    %cst_22 = arith.constant dense<0.000000e+00> : vector<2x256xf32>
    %32 = vector.multi_reduction <add>, %31, %cst_22 [1] : vector<2x16x256xf32> to vector<2x256xf32>
    "tpu.trace_start"() <{level = 10 : i32, message = "nrs,nsx->nrx"}> : () -> ()
    %cst_23 = arith.constant dense<0.000000e+00> : vector<2x16x256xf32>
    %33 = tpu.matmul %1, %29, %cst_23 {dimension_numbers = #tpu.dot_dimension_numbers<[2], [1], [1], [2], [0, 0, 0, 1, 1, 2], [0], [0]>} : vector<2x16x16xf32>, vector<2x16x256xf32>, vector<2x16x256xf32> -> vector<2x16x256xf32>
    "tpu.trace_stop"() : () -> ()
    %34 = arith.mulf %29, %33 : vector<2x16x256xf32>
    %cst_24 = arith.constant dense<0.000000e+00> : vector<2x256xf32>
    %35 = vector.multi_reduction <add>, %34, %cst_24 [1] : vector<2x16x256xf32> to vector<2x256xf32>
    %36 = vector.broadcast %5 : vector<1x256xf32> to vector<2x256xf32>
    %37 = arith.mulf %36, %35 : vector<2x256xf32>
    %cst_25 = arith.constant 1.000000e-16 : f32
    %38 = vector.broadcast %cst_25 : f32 to vector<2x256xf32>
    %39 = arith.maximumf %37, %38 : vector<2x256xf32>
    %40 = math.rsqrt %39 : vector<2x256xf32>
    %41 = arith.mulf %32, %40 : vector<2x256xf32>
    %cst_26 = arith.constant dense<0.000000e+00> : vector<2x16xf32>
    %42 = tpu.matmul %41, %3, %cst_26 {dimension_numbers = #tpu.dot_dimension_numbers<[1], [0], [0], [1], [0, 0, 1, 1], [], []>} : vector<2x256xf32>, vector<256x16xf32>, vector<2x16xf32> -> vector<2x16xf32>
    %43 = vector.broadcast %7 : vector<1x16xf32> to vector<2x16xf32>
    %44 = arith.mulf %42, %43 : vector<2x16xf32>
    %c0_27 = arith.constant 0 : index
    %c0_28 = arith.constant 0 : index
    %c0_29 = arith.constant 0 : index
    %c0_30 = arith.constant 0 : index
    %45 = vector.load %arg8[%c0_27, %c0_28, %c0_29, %c0_30] : memref<1x1x2x16xf32, #tpu.memory_space<vmem>>, vector<1x1x2x16xf32>
    %46 = vector.shape_cast %45 : vector<1x1x2x16xf32> to vector<2x16xf32>
    %47 = vector.shape_cast %44 : vector<2x16xf32> to vector<1x1x2x16xf32>
    tpu.vector_store %arg8[%c0_27, %c0_28, %c0_29, %c0_30], %47 {strides = array<i32>} : memref<1x1x2x16xf32, #tpu.memory_space<vmem>>, vector<1x1x2x16xf32>,
    return
  }
  func.func @transform_0(%arg0: i32, %arg1: i32) -> (i32, i32, i32) {
    %c0_i32 = arith.constant 0 : i32
    %c0_i32_0 = arith.constant 0 : i32
    %c0_i32_1 = arith.constant 0 : i32
    return %arg0, %c0_i32, %c0_i32_0 : i32, i32, i32
  }
  func.func @transform_1(%arg0: i32, %arg1: i32) -> (i32, i32, i32) {
    %c0_i32 = arith.constant 0 : i32
    %c0_i32_0 = arith.constant 0 : i32
    %c0_i32_1 = arith.constant 0 : i32
    return %arg0, %c0_i32, %c0_i32_0 : i32, i32, i32
  }
  func.func @transform_2(%arg0: i32, %arg1: i32) -> (i32, i32, i32) {
    %c0_i32 = arith.constant 0 : i32
    %c0_i32_0 = arith.constant 0 : i32
    %c0_i32_1 = arith.constant 0 : i32
    return %arg1, %c0_i32, %c0_i32_0 : i32, i32, i32
  }
  func.func @transform_3(%arg0: i32, %arg1: i32) -> (i32, i32) {
    %c0_i32 = arith.constant 0 : i32
    %c0_i32_0 = arith.constant 0 : i32
    %c0_i32_1 = arith.constant 0 : i32
    return %c0_i32, %c0_i32_0 : i32, i32
  }
  func.func @transform_4(%arg0: i32, %arg1: i32) -> (i32, i32, i32) {
    %c0_i32 = arith.constant 0 : i32
    %c0_i32_0 = arith.constant 0 : i32
    %c0_i32_1 = arith.constant 0 : i32
    return %arg1, %c0_i32, %c0_i32_0 : i32, i32, i32
  }
  func.func @transform_5(%arg0: i32, %arg1: i32) -> (i32, i32, i32) {
    %c0_i32 = arith.constant 0 : i32
    %c0_i32_0 = arith.constant 0 : i32
    %c0_i32_1 = arith.constant 0 : i32
    return %arg1, %c0_i32, %c0_i32_0 : i32, i32, i32
  }
  func.func @transform_6(%arg0: i32, %arg1: i32) -> (i32, i32, i32, i32) {
    %c0_i32 = arith.constant 0 : i32
    %c0_i32_0 = arith.constant 0 : i32
    %c0_i32_1 = arith.constant 0 : i32
    return %arg0, %arg1, %c0_i32, %c0_i32_0 : i32, i32, i32, i32
  }
}

</mosaic_0001>

<bundles_post_ra>
// kernel: tpu_custom_call.1
= control target key start
LH: loop header
LB: loop body
LE: loop exit
PB: predicated region body
PF: predicated region fallthrough
CT: control target
= control target key end

     0   :  { %11 = vsyncpa [#allocation3], 0  ;;  %s2736_s0 = inlined_call_operand.vmem [shape: f32[2,16,32], index: 0, kind: input, shape index: {}]   ;;  %s2737_s1 = inlined_call_operand.vmem [shape: f32[2,16,16], index: 1, kind: input, shape index: {}]   ;;  %s2738_s2 = inlined_call_operand.hbm [shape: f32[32,16,32], index: 2, kind: input, shape index: {}]   ;;  %s2739_s3 = inlined_call_operand.vmem [shape: f32[256,16], index: 3, kind: input, shape index: {}]   ;;  %s2740_s4 = inlined_call_operand.vmem [shape: f32[2,1,256], index: 4, kind: input, shape index: {}]   ;;  %s2741_s5 = inlined_call_operand.vmem [shape: f32[2,1,16], index: 5, kind: input, shape index: {}]   ;;  %s2742_s6 = inlined_call_operand.hbm [shape: f32[1,2,2,16], index: 6, kind: output, shape index: {}]  }
   0x1   :  { %13 = vsyncpa [#allocation3 + $0x1], 0 }
   0x2   :  { %14 = vsyncpa [#allocation4], 0 }
   0x3   :  { %16 = vsyncpa [#allocation4 + $0x1], 0  ;;  %s2061_s21 = smov 0   ;;  %s2063_s22 = smov 0  }
   0x4   :  { %s2065_s23 = smov 0   ;;  %s2067_s24 = smov 0  }
   0x5   :  { %s2069_s25 = smov 0   ;;  %s2071_s26 = smov 0  }
   0x6 LB: > { %s1546_s27 = sadd.s32 4294967295, %s2019_s26   ;;  %s1547_s28 = sadd.s32 4294967294, %s2019_s26   ;;  %s2019_s26 = sphi %s2071_s26, %s22_s26   ;;  %s2015_s25 = sphi %s2069_s25, %s2777_s25   ;;  %s2011_s24 = sphi %s2067_s24, %s2776_s24   ;;  %s2007_s23 = sphi %s2065_s23, %s2775_s23   ;;  %s2003_s22 = sphi %s2063_s22, %s2774_s22   ;;  %s1999_s21 = sphi %s2061_s21, %s2773_s21  }
   0x7   : > { %s31_s29 = sadd.s32 1, %s2015_s25  ;;  %s93_s30 = sadd.s32 1, %s2007_s23 }
   0x8   : > { %p32_p0 = scmp.ge.s32.totalorder %s31_s29, 2  ;;  %p100_p1 = scmp.ne.s32.totalorder %s2007_s23, %s2003_s22 }
   0x9   : > { %p101_p2 = scmp.eq.s32.totalorder %s2019_s26, 0  ;;  %p106_p3 = scmp.ne.s32.totalorder %s2003_s22, %s1999_s21 }
   0xa   : > { %s2779_s29 = smov (%p32_p0, %s31_s29), 0  ;;  %p107_p5 = scmp.eq.s32.totalorder %s1546_s27, 0 }
   0xb   : > { %p2102_p4 = por %p101_p2, %p100_p1  ;;  %s90_s8 = ssub.s32 %s2015_s25, %s2779_s29 }
   0xc   : > { %p205_p6 = scmp.eq.s32.totalorder %s1546_s27, 1  ;;  %p91_p7 = scmp.eq.s32.totalorder %s90_s8, 0 }
   0xd   : > { %p2108_p8 = por %p107_p5, %p106_p3  ;;  %p211_p10 = scmp.eq.s32.totalorder %s1547_s28, 1 }
   0xe   : > { %p2112_p9 = por %p205_p6, %p100_p1  ;;  %p1814_p13 = scmp.lt.s32.totalorder %s2019_s26, 2 }
   0xf   : > { %s2117_s11 = scalar_select %p91_p7, %s2007_s23, %s93_s30  }
  0x10   : > { %p2119_p11 = por %p211_p10, %p106_p3  ;;  %s254_s13 = sand.u32 1, %s2007_s23  }
  0x11   : > { %s1552_s14 = sshll.u32 %s254_s13, 8  ;;  %s1642_s15 = sshll.u32 %s2015_s25, 12 }
  0x12   : > { %s265_s18 = scalar_lea.hbm %s2738_s2, %s1642_s15  ;;  %s258_s19 = scalar_lea.vmem [#allocation2], %s1552_s14 }
  0x13   : > { %s266_s20 = sshll.u32 %s258_s19, 4  ;;  %p2132_p0 = pnand %p1814_p13, %p2102_p4  ;;  %s267_s20 = int_to_ptr.vmem [resolvable:$true] %s266_s20 }
  0x14   : > { %p1556_p1 = scmp.ge.s32.totalorder %s2019_s26, 1  ;;  %s255_s28 = scalar_lea.sflag [#allocation3], %s254_s13 }
  0x15   : > { %p1913_p2 = pneg %p2132_p0  ;;  %s1924_s30 = scalar_lea.vmem %s267_s20, 4096 }
  0x16   : > { %p1925_p3 = scmp.ne.s32.totalorder %s267_s20, %s1924_s30  ;;  %s2021_s8 = smov [#allocation2]  }
  0x17   : > { %s1929_s16 = sshll.u32 %s2021_s8, 4  ;;  %s1930_s16 = int_to_ptr.vmem [resolvable:$false] %s1929_s16 }
  0x18   : > { %p1927_p5 = pnand %p1925_p3, %p1913_p2  ;;  %s1931_s14 = scalar_lea.vmem %s1930_s16, 8192 }
  0x19   : > { %p1932_p7 = scmp.lt.s32.totalorder %s267_s20, %s1930_s16  ;;  %p1933_p10 = scmp.lt.s32.totalorder %s1931_s14, %s1924_s30 }
  0x1a   : > { %p1928_p6 = pneg %p1927_p5 }
  0x1b   : > { %p1934_p12 = por %p1933_p10, %p1932_p7 }
  0x1d   : > { %p1935_p4 = pnand %p1934_p12, %p1928_p6 }
  0x1f   : > { %1938 = shalt.err (!%p1935_p4)
}
  0x20   : > { %s2022_s7 = smov 128   ;;  %s2023_s13 = smov 8  }
  0x21   : > { %1809 = dma.hbm_to_vmem [thread:$0]  (!%p2132_p0), %s265_s18, 4096, %s267_s20, %s255_s28, %s2022_s7, %s2022_s7, %s2023_s13  }
  0x22   : > { %p287_p13 = scmp.lt.s32.totalorder %s2019_s26, 3 }
  0x24   : > { %p288_p2 = pnand %p1556_p1, %p287_p13 }
  0x26   : > { %291 = sbr.rel (%p288_p2) target bundleno = 1243 (0x4db), region = 44 }
  0x2b   : > { %s2145_s15 = sand.u32 1, %s2003_s22  }
  0x2c   : > { %s1557_s17 = sshll.u32 %s2145_s15, 8  ;;  %s294_s19 = scalar_lea.sflag [#allocation3], %s2145_s15 }
  0x2d   : > { %s2149_s30 = scalar_lea.vmem [#allocation2], %s1557_s17 }
  0x2e   : > { %1990 = dma.done.wait (%p2108_p8), %s294_s19, 4096  }
  0x2f   : > { %1992 = vsyncadd (%p2108_p8), %s294_s19, 4294963200  ;;  %vm441_vm0 = vcmask 261120   ;;  %v406_v0 = vld [vmem:[%s2149_s30 + $0xf8] sm:$0xff]  ;;  %v405_v2 = vld [vmem:[%s2149_s30 + $0xf0] sm:$0xff]  ;;  %vm748_vm1 = vcmask 130048   ;;  %p360_p8 = scmp.lt.s32.totalorder %s2011_s24, 1 }
  0x30   : > { %v390_v1 = vld [vmem:[%s2149_s30 + $0x78] sm:$0xff]  ;;  %1643 = vmatprep.subr.msk.mxu0 %vm441_vm0, %v406_v0  ;;  %v389_v3 = vld [vmem:[%s2149_s30 + $0x70] sm:$0xff]  ;;  %v404_v4 = vld [vmem:[%s2149_s30 + $0xe8] sm:$0xff]  ;;  %vm1287_vm2 = vcmask 1041409   ;;  %s1558_s17 = sshll.u32 %s2145_s15, 1  ;;  %vm1397_vm3 = vcmask 123904  }
  0x31   : > { %1644 = vmatpush3.xpose.msk.msra.mxu0 %vm441_vm0, %v390_v1  ;;  %v388_v5 = vld [vmem:[%s2149_s30 + $0x68] sm:$0xff]  ;;  %v403_v6 = vld [vmem:[%s2149_s30 + $0xe0] sm:$0xff]  ;;  %v402_v9 = vld [vmem:[%s2149_s30 + $0xd8] sm:$0xff]  ;;  %s2663_s8 = scalar_select %p360_p8, %s2011_s24, 1 }
  0x32   : > { %1645 = vmatprep.subr.msk.mxu0 %vm441_vm0, %v405_v2  ;;  %v2171_v7 = vld [vmem:[%s2736_s0] sm:$0xff]  ;;  %v2181_v10 = vld [vmem:[%s2739_s3 + $0xf8] sm:$0xff]  ;;  %v2191_v12 = vld [vmem:[%s2739_s3 + $0xf0] sm:$0xff]  ;;  %s344_s20 = scalar_lea.vmem [#allocation5], %s1558_s17  ;;  %s1400_s7 = scalar_lea.sflag [#allocation4], %s2145_s15 }
  0x33   : > { %v387_v8 = vld [vmem:[%s2149_s30 + $0x60] sm:$0xff]  ;;  %1675 = vmatprep.mubr.msk.f32.mxu0 %vm441_vm0, %v2171_v7  ;;  %v2186_v11 = vld [vmem:[%s2739_s3 + $0x78] sm:$0xff]  ;;  %1683 = vmatprep.subr.mxu1 %v2181_v10  ;;  %v2197_v13 = vld [vmem:[%s2739_s3 + $0x70] sm:$0xff]  ;;  %s1559_s16 = sshll.u32 %s2663_s8, 1  ;;  %s366_s18 = scalar_lea.vmem %s2741_s5, %s2663_s8 }
  0x34   : > { %1684 = vmatpush3.msra.mxu1 %v2186_v11  ;;  %v2204_v14 = vld [vmem:[%s2739_s3 + $0xe8] sm:$0xff]  ;;  %v386_v15 = vld [vmem:[%s2149_s30 + $0x58] sm:$0xff]  ;;  %v401_v17 = vld [vmem:[%s2149_s30 + $0xd0] sm:$0xff]  ;;  %s363_s13 = scalar_lea.vmem %s2740_s4, %s1559_s16  ;;  %s1415_s27 = sshll.u32 %s344_s20, 4  ;;  %s1416_s27 = int_to_ptr.vmem [resolvable:$true] %s1415_s27 }
  0x35   : > { %1646 = vmatpush3.xpose.msk.msra.mxu0 %vm441_vm0, %v389_v3  ;;  %1685 = vmatprep.subr.mxu1 %v2191_v12  ;;  %v2212_v16 = vld [vmem:[%s2739_s3 + $0x68] sm:$0xff]  ;;  %v2219_v18 = vld [vmem:[%s2739_s3 + $0xe0] sm:$0xff]  ;;  %v2232_v20 = vld [vmem:[%s2739_s3 + $0xd8] sm:$0xff]  ;;  %s2025_s8 = smov [#allocation5]  }
  0x36   : > { %1647 = vmatprep.subr.msk.mxu0 %vm441_vm0, %v404_v4  ;;  %1686 = vmatpush3.msra.mxu1 %v2197_v13  ;;  %v2225_v19 = vld [vmem:[%s2739_s3 + $0x60] sm:$0xff]  ;;  %v385_v21 = vld [vmem:[%s2149_s30 + $0x50] sm:$0xff]  ;;  %v2240_v22 = vld [vmem:[%s2739_s3 + $0x58] sm:$0xff]  ;;  %s1943_s19 = sshll.u32 %s2025_s8, 4  ;;  %s1944_s19 = int_to_ptr.vmem [resolvable:$false] %s1943_s19 }
  0x37   : > { %1687 = vmatprep.subr.mxu1 %v2204_v14  ;;  %v400_v23 = vld [vmem:[%s2149_s30 + $0xc8] sm:$0xff]  ;;  %v2247_v24 = vld [vmem:[%s2739_s3 + $0xd0] sm:$0xff]  ;;  %v399_v29 = vld [vmem:[%s2149_s30 + $0xc0] sm:$0xff]  ;;  %p1946_p3 = scmp.lt.s32.totalorder %s1416_s27, %s1944_s19 }
  0x38   : > { %1688 = vmatpush3.msra.mxu1 %v2212_v16  ;;  %v2253_v25 = vld [vmem:[%s2739_s3 + $0x50] sm:$0xff]  ;;  %v2260_v26 = vld [vmem:[%s2739_s3 + $0xc8] sm:$0xff]  ;;  %v2275_v30 = vld [vmem:[%s2739_s3 + $0xc0] sm:$0xff] }
  0x39   : > { %1648 = vmatpush3.xpose.msk.msra.mxu0 %vm441_vm0, %v388_v5  ;;  %1689 = vmatprep.subr.mxu1 %v2219_v18  ;;  %v384_v27 = vld [vmem:[%s2149_s30 + $0x48] sm:$0xff]  ;;  %v2281_v31 = vld [vmem:[%s2739_s3 + $0x40] sm:$0xff]  ;;  %v2288_v32 = vld [vmem:[%s2739_s3 + $0xb8] sm:$0xff] }
  0x3a   : > { %1649 = vmatprep.subr.msk.mxu0 %vm441_vm0, %v403_v6  ;;  %1690 = vmatpush3.msra.mxu1 %v2225_v19  ;;  %v2268_v28 = vld [vmem:[%s2739_s3 + $0x48] sm:$0xff]  ;;  %v383_v33 = vld [vmem:[%s2149_s30 + $0x40] sm:$0xff]  ;;  %v2296_v34 = vld [vmem:[%s2739_s3 + $0x38] sm:$0xff] }
  0x3b   : > { %1691 = vmatprep.subr.mxu1 %v2232_v20  ;;  %v398_v35 = vld [vmem:[%s2149_s30 + $0xb8] sm:$0xff]  ;;  %v2303_v36 = vld [vmem:[%s2739_s3 + $0xb0] sm:$0xff]  ;;  %v2316_v38 = vld [vmem:[%s2739_s3 + $0xa8] sm:$0xff] }
  0x3c   : > { %1692 = vmatpush3.msra.mxu1 %v2240_v22  ;;  %v2309_v37 = vld [vmem:[%s2739_s3 + $0x30] sm:$0xff]  ;;  %v382_v39 = vld [vmem:[%s2149_s30 + $0x38] sm:$0xff]  ;;  %v2324_v40 = vld [vmem:[%s2739_s3 + $0x28] sm:$0xff] }
  0x3d   : > { %1650 = vmatpush3.xpose.msk.msra.mxu0 %vm441_vm0, %v387_v8  ;;  %1693 = vmatprep.subr.mxu1 %v2247_v24  ;;  %v397_v41 = vld [vmem:[%s2149_s30 + $0xb0] sm:$0xff]  ;;  %v396_v43 = vld [vmem:[%s2149_s30 + $0xa8] sm:$0xff]  ;;  %v395_v45 = vld [vmem:[%s2149_s30 + $0xa0] sm:$0xff] }
  0x3e   : > { %1651 = vmatprep.subr.msk.mxu0 %vm441_vm0, %v402_v9  ;;  %1694 = vmatpush3.msra.mxu1 %v2253_v25  ;;  %v381_v42 = vld [vmem:[%s2149_s30 + $0x30] sm:$0xff]  ;;  %v380_v44 = vld [vmem:[%s2149_s30 + $0x28] sm:$0xff]  ;;  %v379_v46 = vld [vmem:[%s2149_s30 + $0x20] sm:$0xff] }
  0x3f   : > { %1695 = vmatprep.subr.mxu1 %v2260_v26  ;;  %v394_v47 = vld [vmem:[%s2149_s30 + $0x98] sm:$0xff]  ;;  %v393_v49 = vld [vmem:[%s2149_s30 + $0x90] sm:$0xff]  ;;  %v392_v51 = vld [vmem:[%s2149_s30 + $0x88] sm:$0xff] }
  0x40   : > { %1696 = vmatpush3.msra.mxu1 %v2268_v28  ;;  %v378_v48 = vld [vmem:[%s2149_s30 + $0x18] sm:$0xff]  ;;  %v377_v50 = vld [vmem:[%s2149_s30 + $0x10] sm:$0xff]  ;;  %v376_v52 = vld [vmem:[%s2149_s30 + $0x8] sm:$0xff] }
  0x41   : > { %1652 = vmatpush3.xpose.msk.msra.mxu0 %vm441_vm0, %v386_v15  ;;  %1697 = vmatprep.subr.mxu1 %v2275_v30  ;;  %v391_v53 = vld [vmem:[%s2149_s30 + $0x80] sm:$0xff]  ;;  %v368_v55 = vld [vmem:[%s2736_s0 + $0x8] sm:$0xff]  ;;  %v369_v56 = vld [vmem:[%s2736_s0 + $0x10] sm:$0xff] }
  0x42   : > { %1653 = vmatprep.subr.msk.mxu0 %vm441_vm0, %v401_v17  ;;  %1698 = vmatpush3.msra.mxu1 %v2281_v31  ;;  %v375_v54 = vld [vmem:[%s2149_s30] sm:$0xff]  ;;  %v370_v57 = vld [vmem:[%s2736_s0 + $0x18] sm:$0xff]  ;;  %v2402_v62 = vld [vmem:[%s2739_s3 + $0x90] sm:$0xff]  ;;  %s1638_s30 = sshll.u32 %s2011_s24, 5  ;;  %s1945_s24 = scalar_lea.vmem %s1944_s19, 64 }
  0x43   : > { %1699 = vmatprep.subr.mxu1 %v2288_v32  ;;  %v2378_v58 = vld [vmem:[%s2739_s3 + $0xa0] sm:$0xff]  ;;  %v2390_v60 = vld [vmem:[%s2739_s3 + $0x98] sm:$0xff]  ;;  %v2408_v63 = vld [vmem:[%s2739_s3 + $0x10] sm:$0xff]  ;;  %s1413_s14 = scalar_lea.hbm %s2742_s6, %s1638_s30 }
  0x44   : > { %1700 = vmatpush3.msra.mxu1 %v2296_v34  ;;  %v2384_v59 = vld [vmem:[%s2739_s3 + $0x20] sm:$0xff]  ;;  %v2396_v61 = vld [vmem:[%s2739_s3 + $0x18] sm:$0xff]  ;;  %v2414_v0 = vld [vmem:[%s2739_s3 + $0x88] sm:$0xff] }
  0x45   : > { %1654 = vmatpush3.xpose.msk.msra.mxu0 %vm441_vm0, %v385_v21  ;;  %1701 = vmatprep.subr.mxu1 %v2303_v36  ;;  %v2420_v1 = vld [vmem:[%s2739_s3 + $0x8] sm:$0xff]  ;;  %v2426_v2 = vld [vmem:[%s2739_s3 + $0x80] sm:$0xff] }
  0x46   : > { %1655 = vmatprep.subr.msk.mxu0 %vm441_vm0, %v400_v23  ;;  %1702 = vmatpush3.msra.mxu1 %v2309_v37  ;;  %v2432_v3 = vld [vmem:[%s2739_s3] sm:$0xff] }
  0x47   : > { %1703 = vmatprep.subr.mxu1 %v2316_v38 }
  0x48   : > { %1704 = vmatpush3.msra.mxu1 %v2324_v40 }
  0x49   : > { %1656 = vmatpush3.xpose.msk.msra.mxu0 %vm441_vm0, %v384_v27  ;;  %1705 = vmatprep.subr.mxu1 %v2378_v58 }
  0x4a   : > { %1657 = vmatprep.subr.msk.mxu0 %vm441_vm0, %v399_v29  ;;  %1706 = vmatpush3.msra.mxu1 %v2384_v59 }
  0x4b   : > { %1707 = vmatprep.subr.mxu1 %v2390_v60 }
  0x4c   : > { %1708 = vmatpush3.msra.mxu1 %v2396_v61 }
  0x4d   : > { %1658 = vmatpush3.xpose.msk.msra.mxu0 %vm441_vm0, %v383_v33  ;;  %1709 = vmatprep.subr.mxu1 %v2402_v62 }
  0x4e   : > { %1659 = vmatprep.subr.msk.mxu0 %vm441_vm0, %v398_v35  ;;  %1710 = vmatpush3.msra.mxu1 %v2408_v63 }
  0x4f   : > { %1711 = vmatprep.subr.mxu1 %v2414_v0 }
  0x50   : > { %1712 = vmatpush3.msra.mxu1 %v2420_v1 }
  0x51   : > { %1660 = vmatpush3.xpose.msk.msra.mxu0 %vm441_vm0, %v382_v39  ;;  %1713 = vmatprep.subr.mxu1 %v2426_v2 }
  0x52   : > { %1661 = vmatprep.subr.msk.mxu0 %vm441_vm0, %v397_v41  ;;  %1714 = vmatpush3.msra.mxu1 %v2432_v3 }
  0x53   : > { %1727 = vmatprep.subr.msk.mxu1 %vm748_vm1, %v2181_v10 }
  0x55   : > { %1662 = vmatpush3.xpose.msk.msra.mxu0 %vm441_vm0, %v381_v42 }
  0x56   : > { %1663 = vmatprep.subr.msk.mxu0 %vm441_vm0, %v396_v43 }
  0x59   : > { %1664 = vmatpush3.xpose.msk.msra.mxu0 %vm441_vm0, %v380_v44 }
  0x5a   : > { %1665 = vmatprep.subr.msk.mxu0 %vm441_vm0, %v395_v45 }
  0x5d   : > { %1666 = vmatpush3.xpose.msk.msra.mxu0 %vm441_vm0, %v379_v46 }
  0x5e   : > { %1667 = vmatprep.subr.msk.mxu0 %vm441_vm0, %v394_v47 }
  0x61   : > { %1668 = vmatpush3.xpose.msk.msra.mxu0 %vm441_vm0, %v378_v48 }
  0x62   : > { %1669 = vmatprep.subr.msk.mxu0 %vm441_vm0, %v393_v49 }
  0x65   : > { %1670 = vmatpush3.xpose.msk.msra.mxu0 %vm441_vm0, %v377_v50 }
  0x66   : > { %1671 = vmatprep.subr.msk.mxu0 %vm441_vm0, %v392_v51 }
  0x69   : > { %1672 = vmatpush3.xpose.msk.msra.mxu0 %vm441_vm0, %v376_v52 }
  0x6a   : > { %1673 = vmatprep.subr.msk.mxu0 %vm441_vm0, %v391_v53 }
  0x6d   : > { %1674 = vmatpush3.xpose.msk.msra.mxu0 %vm441_vm0, %v375_v54 }
  0x70   : > { %1676 = vmatmul.mubr.msk.f32.vlgmr.msra.gmra.mxu0 %vm441_vm0, %v2171_v7 }
  0x71   : > { %1677 = vmatprep.mubr.msk.f32.mxu0 %vm441_vm0, %v368_v55 }
  0x74   : > { %1678 = vmatmul.mubr.msk.f32.gmra.mxu0 %vm441_vm0, %v368_v55 }
  0x75   : > { %1679 = vmatprep.mubr.msk.f32.mxu0 %vm441_vm0, %v369_v56 }
  0x78   : > { %1680 = vmatmul.mubr.msk.f32.gmra.mxu0 %vm441_vm0, %v369_v56 }
  0x79   : > { %1681 = vmatprep.mubr.msk.f32.mxu0 %vm441_vm0, %v370_v57 }
  0x7c   : > { %1682 = vmatmul.mubr.msk.f32.gmra.mxu0 %vm441_vm0, %v370_v57 }
 0x130   : > { %v2437_v4 = vpop.f32.mrf.mxu0 }
 0x131   : > { %2757 = vst [vmem:[#allocation8_spill] sm:$0xff] %v2437_v4  ;;  %v639_v5 = vmul.f32 0.1, %v2437_v4 }
 0x132   : > { %v2440_v6 = vpop.f32.mrf.mxu0 }
 0x133   : > { %2758 = vst [vmem:[#allocation9_spill] sm:$0xff] %v2440_v6  ;;  %v640_v7 = vmul.f32 0.1, %v2440_v6  ;;  %v2444_v8 = vmax.f32 %v2437_v4, %v639_v5 }
 0x134   : > { %v2446_v9 = vpop.f32.mrf.mxu0 }
 0x135   : > { %2759 = vst [vmem:[#allocation10_spill] sm:$0xff] %v2446_v9  ;;  %v641_v15 = vmul.f32 0.1, %v2446_v9  ;;  %v2450_v17 = vmax.f32 %v2440_v6, %v640_v7  ;;  %v655_v35 = vmul.f32 %v2444_v8, %v2444_v8 }
 0x136   : > { %v2452_v21 = vpop.f32.mrf.mxu0 }
 0x137   : > { %2760 = vst [vmem:[#allocation11_spill] sm:$0xff] %v2452_v21  ;;  %v642_v23 = vmul.f32 0.1, %v2452_v21  ;;  %v656_v27 = vmul.f32 %v2450_v17, %v2450_v17  ;;  %v2458_v29 = vmax.f32 %v2446_v9, %v641_v15 }
 0x138   : > { %v2460_v33 = vpop.f32.mrf.mxu0 }
 0x139   : > { %2761 = vst [vmem:[#allocation12_spill] sm:$0xff] %v2460_v33  ;;  %v2465_v39 = vmax.f32 %v2452_v21, %v642_v23  ;;  %v643_v41 = vmul.f32 0.1, %v2460_v33  ;;  %727 = vmatprep.mubr.f32.mxu1 %v656_v27  ;;  %v657_v47 = vmul.f32 %v2458_v29, %v2458_v29 }
 0x13a   : > { %v2468_v42 = vpop.f32.mrf.mxu0  ;;  %728 = vmatmul.mubr.f32.vlgmr.msra.gmra.mxu1 %v655_v35 }
 0x13b   : > { %2762 = vst [vmem:[#allocation13_spill] sm:$0xff] %v2468_v42  ;;  %v644_v43 = vmul.f32 0.1, %v2468_v42  ;;  %v658_v44 = vmul.f32 %v2465_v39, %v2465_v39  ;;  %1728 = vmatpush3.xpose.msk.msra.mxu1 %vm748_vm1, %v2186_v11  ;;  %v2476_v45 = vmax.f32 %v2460_v33, %v643_v41 }
 0x13c   : > { %v2478_v46 = vpop.f32.mrf.mxu0  ;;  %1729 = vmatprep.subr.msk.mxu1 %vm748_vm1, %v2191_v12 }
 0x13d   : > { %v2485_v48 = vmax.f32 %v2468_v42, %v644_v43  ;;  %v645_v49 = vmul.f32 0.1, %v2478_v46  ;;  %732 = vmatprep.mubr.f32.mxu1 %v658_v44  ;;  %v659_v54 = vmul.f32 %v2476_v45, %v2476_v45 }
 0x13e   : > { %v2488_v50 = vpop.f32.mrf.mxu0  ;;  %733 = vmatmul.mubr.f32.gmra.mxu1 %v657_v47 }
 0x13f   : > { %2763 = vst [vmem:[#allocation14_spill] sm:$0xff] %v2488_v50  ;;  %v646_v51 = vmul.f32 0.1, %v2488_v50  ;;  %v660_v52 = vmul.f32 %v2485_v48, %v2485_v48  ;;  %1730 = vmatpush3.xpose.msk.msra.mxu1 %vm748_vm1, %v2197_v13  ;;  %v2496_v53 = vmax.f32 %v2478_v46, %v645_v49 }
 0x140   : > { %1731 = vmatprep.subr.msk.mxu1 %vm748_vm1, %v2204_v14 }
 0x141   : > { %v2503_v55 = vmax.f32 %v2488_v50, %v646_v51  ;;  %737 = vmatprep.mubr.f32.mxu1 %v660_v52  ;;  %v661_v57 = vmul.f32 %v2496_v53, %v2496_v53  ;;  %v2743_v52 = vmov 0.0  }
 0x142   : > { %738 = vmatmul.mubr.f32.gmra.mxu1 %v659_v54  ;;  %1223 = vmatprep.mubr.f32.mxu0 %v2743_v52 }
 0x143   : > { %v662_v56 = vmul.f32 %v2503_v55, %v2503_v55  ;;  %1732 = vmatpush3.xpose.msk.msra.mxu1 %vm748_vm1, %v2212_v16 }
 0x144   : > { %1733 = vmatprep.subr.msk.mxu1 %vm748_vm1, %v2219_v18 }
 0x145   : > { %742 = vmatprep.mubr.f32.mxu1 %v662_v56 }
 0x146   : > { %743 = vmatmul.mubr.f32.gmra.mxu1 %v661_v57 }
 0x147   : > { %1734 = vmatpush3.xpose.msk.msra.mxu1 %vm748_vm1, %v2225_v19 }
 0x148   : > { %1735 = vmatprep.subr.msk.mxu1 %vm748_vm1, %v2232_v20 }
 0x14b   : > { %1736 = vmatpush3.xpose.msk.msra.mxu1 %vm748_vm1, %v2240_v22 }
 0x14c   : > { %1737 = vmatprep.subr.msk.mxu1 %vm748_vm1, %v2247_v24 }
 0x14f   : > { %1738 = vmatpush3.xpose.msk.msra.mxu1 %vm748_vm1, %v2253_v25 }
 0x150   : > { %1739 = vmatprep.subr.msk.mxu1 %vm748_vm1, %v2260_v26 }
 0x153   : > { %1740 = vmatpush3.xpose.msk.msra.mxu1 %vm748_vm1, %v2268_v28 }
 0x154   : > { %1741 = vmatprep.subr.msk.mxu1 %vm748_vm1, %v2275_v30 }
 0x157   : > { %1742 = vmatpush3.xpose.msk.msra.mxu1 %vm748_vm1, %v2281_v31 }
 0x158   : > { %1743 = vmatprep.subr.msk.mxu1 %vm748_vm1, %v2288_v32 }
 0x15b   : > { %1744 = vmatpush3.xpose.msk.msra.mxu1 %vm748_vm1, %v2296_v34 }
 0x15c   : > { %1745 = vmatprep.subr.msk.mxu1 %vm748_vm1, %v2303_v36 }
 0x15f   : > { %1746 = vmatpush3.xpose.msk.msra.mxu1 %vm748_vm1, %v2309_v37 }
 0x160   : > { %1747 = vmatprep.subr.msk.mxu1 %vm748_vm1, %v2316_v38 }
 0x163   : > { %1748 = vmatpush3.xpose.msk.msra.mxu1 %vm748_vm1, %v2324_v40 }
 0x164   : > { %1749 = vmatprep.subr.msk.mxu1 %vm748_vm1, %v2378_v58 }
 0x167   : > { %1750 = vmatpush3.xpose.msk.msra.mxu1 %vm748_vm1, %v2384_v59 }
 0x168   : > { %1751 = vmatprep.subr.msk.mxu1 %vm748_vm1, %v2390_v60 }
 0x16b   : > { %1752 = vmatpush3.xpose.msk.msra.mxu1 %vm748_vm1, %v2396_v61 }
 0x16c   : > { %1753 = vmatprep.subr.msk.mxu1 %vm748_vm1, %v2402_v62 }
 0x16f   : > { %1754 = vmatpush3.xpose.msk.msra.mxu1 %vm748_vm1, %v2408_v63 }
 0x170   : > { %1755 = vmatprep.subr.msk.mxu1 %vm748_vm1, %v2414_v0 }
 0x173   : > { %1756 = vmatpush3.xpose.msk.msra.mxu1 %vm748_vm1, %v2420_v1 }
 0x174   : > { %1757 = vmatprep.subr.msk.mxu1 %vm748_vm1, %v2426_v2 }
 0x177   : > { %1758 = vmatpush3.xpose.msk.msra.mxu1 %vm748_vm1, %v2432_v3 }
 0x1fa   : > { %v1715_v5 = vpop.f32.mrf.mxu1 }
 0x1fc   : > { %v1716_v7 = vpop.f32.mrf.mxu1 }
 0x1fd   : > { %v1717_v15 = vadd.f32 %v1716_v7, %v1715_v5 }
 0x1fe   : > { %v1718_v23 = vpop.f32.mrf.mxu1 }
 0x1ff   : > { %1759 = vmatprep.mubr.msk.f32.mxu1 %vm748_vm1, %v1717_v15 }
 0x200   : > { %v1719_v27 = vpop.f32.mrf.mxu1  ;;  %1760 = vmatmul.mubr.msk.f32.vlgmr.msra.gmra.mxu1 %vm748_vm1, %v1717_v15 }
 0x201   : > { %v1720_v35 = vadd.f32 %v1719_v27, %v1718_v23 }
 0x202   : > { %v1721_v41 = vpop.f32.mrf.mxu1 }
 0x203   : > { %1761 = vmatprep.mubr.msk.f32.mxu1 %vm748_vm1, %v1720_v35 }
 0x204   : > { %v1722_v43 = vpop.f32.mrf.mxu1  ;;  %1762 = vmatmul.mubr.msk.f32.gmra.mxu1 %vm748_vm1, %v1720_v35 }
 0x205   : > { %v1723_v44 = vadd.f32 %v1722_v43, %v1721_v41 }
 0x206   : > { %v1724_v47 = vpop.f32.mrf.mxu1 }
 0x207   : > { %1763 = vmatprep.mubr.msk.f32.mxu1 %vm748_vm1, %v1723_v44 }
 0x208   : > { %v1725_v49 = vpop.f32.mrf.mxu1  ;;  %1764 = vmatmul.mubr.msk.f32.gmra.mxu1 %vm748_vm1, %v1723_v44 }
 0x209   : > { %v1726_v51 = vadd.f32 %v1725_v49, %v1724_v47 }
 0x20b   : > { %1765 = vmatprep.mubr.msk.f32.mxu1 %vm748_vm1, %v1726_v51 }
 0x20c   : > { %1766 = vmatmul.mubr.msk.f32.gmra.mxu1 %vm748_vm1, %v1726_v51 }
 0x20d   : > { %1140 = vmatprep.mubr.f32.mxu1 %v2743_v52 }
 0x2c0   : > { %v923_v54 = vpop.f32.mrf.mxu1 }
 0x2c1   : > { %v946_v56 = vmax.f32 %v923_v54, 1e-16 }
 0x2c2   : > { %v925_v57 = vpop.f32.mrf.mxu1 }
 0x2c3   : > { %1867 = vrsqrt.f32 %v946_v56  ;;  %v947_v5 = vmax.f32 %v925_v57, 1e-16 }
 0x2c4   : > { %v929_v7 = vpop.f32.mrf.mxu1 }
 0x2c5   : > { %1869 = vrsqrt.f32 %v947_v5  ;;  %v948_v15 = vmax.f32 %v929_v7, 1e-16 }
 0x2c6   : > { %v931_v23 = vpop.f32.mrf.mxu1 }
 0x2c7   : > { %1871 = vrsqrt.f32 %v948_v15  ;;  %v949_v27 = vmax.f32 %v931_v23, 1e-16 }
 0x2c8   : > { %v935_v35 = vpop.f32.mrf.mxu1 }
 0x2c9   : > { %1873 = vrsqrt.f32 %v949_v27  ;;  %v950_v41 = vmax.f32 %v935_v35, 1e-16 }
 0x2ca   : > { %v937_v43 = vpop.f32.mrf.mxu1 }
 0x2cb   : > { %1875 = vrsqrt.f32 %v950_v41  ;;  %v951_v44 = vmax.f32 %v937_v43, 1e-16 }
 0x2cc   : > { %v941_v47 = vpop.f32.mrf.mxu1 }
 0x2cd   : > { %1877 = vrsqrt.f32 %v951_v44  ;;  %v952_v49 = vmax.f32 %v941_v47, 1e-16 }
 0x2ce   : > { %v943_v51 = vpop.f32.mrf.mxu1 }
 0x2cf   : > { %1879 = vrsqrt.f32 %v952_v49  ;;  %v953_v54 = vmax.f32 %v943_v51, 1e-16 }
 0x2d0   : > { %v1868_v56 = vpop.eup %1867 }
 0x2d1   : > { %v962_v57 = vmul.f32 %v1868_v56, %v2444_v8  ;;  %1881 = vrsqrt.f32 %v953_v54 }
 0x2d2   : > { %v1870_v5 = vpop.eup %1869 }
 0x2d3   : > { %v970_v7 = vmul.f32 9.0, %v962_v57  ;;  %v963_v15 = vmul.f32 %v1870_v5, %v2450_v17 }
 0x2d4   : > { %v1872_v23 = vpop.eup %1871 }
 0x2d5   : > { %v971_v27 = vmul.f32 9.0, %v963_v15  ;;  %v964_v35 = vmul.f32 %v1872_v23, %v2458_v29  ;;  %v978_v43 = vmul.f32 1.442695, %v970_v7 }
 0x2d6   : > { %v1874_v41 = vpop.eup %1873 }
 0x2d7   : > { %v972_v52 = vmul.f32 9.0, %v964_v35  ;;  %v965_v44 = vmul.f32 %v1874_v41, %v2465_v39  ;;  %v980_v49 = vmul.f32 1.442695, %v971_v27  ;;  %1883 = vpow2.f32 %v978_v43 }
 0x2d8   : > { %v1876_v47 = vpop.eup %1875 }
 0x2d9   : > { %v982_v51 = vmul.f32 1.442695, %v972_v52  ;;  %v973_v4 = vmul.f32 9.0, %v965_v44  ;;  %v966_v8 = vmul.f32 %v1876_v47, %v2476_v45 }
 0x2da   : > { %v1878_v54 = vpop.eup %1877 }
 0x2db   : > { %1885 = vpow2.f32 %v982_v51  ;;  %v984_v56 = vmul.f32 1.442695, %v973_v4  ;;  %v974_v17 = vmul.f32 9.0, %v966_v8  ;;  %v967_v57 = vmul.f32 %v1878_v54, %v2485_v48 }
 0x2dc   : > { %v1880_v5 = vpop.eup %1879  ;;  %1887 = vpow2.f32 %v980_v49 }
 0x2dd   : > { %1889 = vpow2.f32 %v984_v56  ;;  %v975_v29 = vmul.f32 9.0, %v967_v57  ;;  %v968_v7 = vmul.f32 %v1880_v5, %v2496_v53  ;;  %v986_v15 = vmul.f32 1.442695, %v974_v17 }
 0x2de   : > { %v1882_v39 = vpop.eup %1881 }
 0x2df   : > { %v976_v23 = vmul.f32 9.0, %v968_v7  ;;  %v969_v52 = vmul.f32 %v1882_v39, %v2503_v55  ;;  %v988_v27 = vmul.f32 1.442695, %v975_v29  ;;  %1891 = vpow2.f32 %v986_v15 }
 0x2e1   : > { %v990_v45 = vmul.f32 1.442695, %v976_v23  ;;  %v977_v35 = vmul.f32 9.0, %v969_v52 }
 0x2e3   : > { %1893 = vpow2.f32 %v990_v45  ;;  %v992_v4 = vmul.f32 1.442695, %v977_v35 }
 0x2e4   : > { %1895 = vpow2.f32 %v988_v27  ;;  %v1884_v48 = vpop.eup %1883 }
 0x2e5   : > { %1897 = vpow2.f32 %v992_v4 }
 0x2e8   : > { %v1886_v41 = vpop.eup %1885 }
 0x2e9   : > { %v1888_v43 = vpop.eup %1887  ;;  %v994_v44 = vadd.f32 %v1886_v41, %v1884_v48 }
 0x2ea   : > { %v1890_v47 = vpop.eup %1889 }
 0x2eb   : > { %v1001_v49 = vadd.f32 %v1890_v47, %v1888_v43  ;;  %v995_v53 = vrot.slane %v994_v44, 4 }
 0x2ec   : > { %v1892_v54 = vpop.eup %1891 }
 0x2ed   : > { %v1002_v51 = vrot.slane %v1001_v49, 4  ;;  %v996_v8 = vadd.f32 %v995_v53, %v994_v44 }
 0x2ef   : > { %v1003_v56 = vadd.f32 %v1002_v51, %v1001_v49  ;;  %v997_v55 = vrot.slane %v996_v8, 2 }
 0x2f0   : > { %v1894_v17 = vpop.eup %1893 }
 0x2f1   : > { %v1896_v57 = vpop.eup %1895  ;;  %v1004_v5 = vrot.slane %v1003_v56, 2  ;;  %v998_v29 = vadd.f32 %v997_v55, %v996_v8  ;;  %v1008_v7 = vadd.f32 %v1894_v17, %v1892_v54 }
 0x2f2   : > { %v1898_v39 = vpop.eup %1897 }
 0x2f3   : > { %v1005_v15 = vadd.f32 %v1004_v5, %v1003_v56  ;;  %v999_v23 = vrot.slane %v998_v29, 1  ;;  %v1015_v52 = vadd.f32 %v1898_v39, %v1896_v57  ;;  %v1009_v27 = vrot.slane %v1008_v7, 4 }
 0x2f5   : > { %v1006_v45 = vrot.slane %v1005_v15, 1  ;;  %v1000_v35 = vadd.f32 %v999_v23, %v998_v29  ;;  %v1016_v4 = vrot.slane %v1015_v52, 4  ;;  %v1010_v6 = vadd.f32 %v1009_v27, %v1008_v7  ;;  %v373_v23 = vld [vmem:[%s2737_s1 + $0x10] sm:$0xff] }
 0x2f7   : > { %v1007_v21 = vadd.f32 %v1006_v45, %v1005_v15  ;;  %v1017_v9 = vadd.f32 %v1016_v4, %v1015_v52  ;;  %v1011_v44 = vrot.slane %v1010_v6, 2  ;;  %1899 = vrcp.f32 %v1000_v35  ;;  %v2766_v35 = vld [vmem:[#allocation14_spill] sm:$0xff] }
 0x2f9   : > { %1901 = vrcp.f32 %v1007_v21  ;;  %v1018_v49 = vrot.slane %v1017_v9, 2  ;;  %v1012_v53 = vadd.f32 %v1011_v44, %v1010_v6  ;;  %v2767_v44 = vld [vmem:[#allocation13_spill] sm:$0xff] }
 0x2fb   : > { %v1019_v51 = vadd.f32 %v1018_v49, %v1017_v9  ;;  %v1013_v42 = vrot.slane %v1012_v53, 1  ;;  %v371_v9 = vld [vmem:[%s2737_s1] sm:$0xff] }
 0x2fd   : > { %v1020_v8 = vrot.slane %v1019_v51, 1  ;;  %v1014_v55 = vadd.f32 %v1013_v42, %v1012_v53 }
 0x2ff   : > { %v1021_v50 = vadd.f32 %v1020_v8, %v1019_v51  ;;  %1903 = vrcp.f32 %v1014_v55  ;;  %v2768_v51 = vld [vmem:[#allocation10_spill] sm:$0xff] }
 0x301   : > { %1905 = vrcp.f32 %v1021_v50  ;;  %v2764_v50 = vmov 0.0  }
 0x304   : > { %v1900_v56 = vpop.eup %1899 }
 0x305   : > { %v2583_v29 = vmul.f32 %v1900_v56, %v1886_v41  ;;  %v2589_v6 = vmul.f32 %v1900_v56, %v1884_v48  ;;  %v372_v41 = vld [vmem:[%s2737_s1 + $0x8] sm:$0xff] }
 0x306   : > { %v1902_v5 = vpop.eup %1901 }
 0x307   : > { %v2581_v33 = vmul.f32 %v1902_v5, %v1890_v47  ;;  %v2586_v7 = vmul.f32 %v1902_v5, %v1888_v43  ;;  %v439_v5 = vld [vmem:[%s363_s13] sm:$0x3]  ;;  %s1939_s13 = scalar_lea.vmem %s1416_s27, 32 }
 0x308   : > { %p1940_p12 = scmp.ne.s32.totalorder %s1416_s27, %s1939_s13  ;;  %p1947_p5 = scmp.lt.s32.totalorder %s1945_s24, %s1939_s13 }
 0x309   : > { %1104 = vmatprep.subr.mxu1 %v2581_v33 }
 0x30a   : > { %1105 = vmatpush1.msra.mxu1 %v2583_v29  ;;  %p1941_p0 = pnand %p1940_p12, %p2112_p9  ;;  %p1948_p6 = por %p1947_p5, %p1946_p3 }
 0x30b   : > { %1106 = vmatprep.subr.mxu1 %v2586_v7 }
 0x30c   : > { %1107 = vmatpush1.msra.mxu1 %v2589_v6  ;;  %v1904_v21 = vpop.eup %1903  ;;  %p1942_p1 = pneg %p1941_p0 }
 0x30d   : > { %1632 = vmatmul.mubr.msk.f32.vlgmr.msra.gmra.mxu1 %vm748_vm1, %v371_v9  ;;  %v2603_v43 = vmul.f32 %v1904_v21, %v1894_v17  ;;  %v2610_v15 = vmul.f32 %v1904_v21, %v1892_v54  ;;  %v374_v17 = vld [vmem:[%s2737_s1 + $0x18] sm:$0xff] }
 0x30e   : > { %v1906_v42 = vpop.eup %1905  ;;  %1146 = vmatprep.mubr.f32.mxu1 %v2764_v50  ;;  %v2769_v9 = vld [vmem:[#allocation11_spill] sm:$0xff]  ;;  %p1949_p7 = pnand %p1948_p6, %p1942_p1 }
 0x30f   : > { %v2601_v48 = vmul.f32 %v1906_v42, %v1898_v39  ;;  %v2607_v47 = vmul.f32 %v1906_v42, %v1896_v57  ;;  %v1040_v54 = vmul.f32 %v2603_v43, %v2478_v46  ;;  %v2765_v57 = vld [vmem:[#allocation12_spill] sm:$0xff]  ;;  %v1036_v46 = vmul.f32 %v2583_v29, %v2768_v51  ;;  %v2770_v42 = vld [vmem:[#allocation9_spill] sm:$0xff] }
 0x310   : > { %v1038_v39 = vmul.f32 %v2610_v15, %v2765_v57  ;;  %v1037_v21 = vmul.f32 %v2581_v33, %v2769_v9  ;;  %v1636_v9 = vld [vmem:[%s366_s18] ss:$0 sm:$0xff] }
 0x311   : > { %1633 = vmatmul.mubr.msk.f32.gmra.mxu1 %vm748_vm1, %v372_v41  ;;  %1187 = vmatprep.subr.mxu0 %v2601_v48  ;;  %v1041_v4 = vmul.f32 %v2601_v48, %v2766_v35  ;;  %v1039_v49 = vmul.f32 %v2607_v47, %v2767_v44 }
 0x312   : > { %1188 = vmatpush1.msra.mxu0 %v2603_v43  ;;  %v1056_v41 = vadd.f32 %v1040_v54, %v1038_v39 }
 0x313   : > { %1189 = vmatprep.subr.mxu0 %v2607_v47 }
 0x314   : > { %1190 = vmatpush1.msra.mxu0 %v2610_v15 }
 0x315   : > { %1634 = vmatmul.mubr.msk.f32.vlgmr.msra.gmra.mxu0 %vm748_vm1, %v373_v23  ;;  %1767 = vmatprep.subr.mxu0 %v2181_v10 }
 0x316   : > { %1229 = vmatprep.mubr.f32.mxu0 %v2764_v50  ;;  %1768 = vmatpush3.msra.mxu0 %v2186_v11  ;;  %v1035_v50 = vmul.f32 %v2586_v7, %v2770_v42 }
 0x317   : > { %1769 = vmatprep.subr.mxu0 %v2191_v12 }
 0x318   : > { %1770 = vmatpush3.msra.mxu0 %v2197_v13 }
 0x319   : > { %1635 = vmatmul.mubr.msk.f32.gmra.mxu0 %vm748_vm1, %v374_v17  ;;  %1771 = vmatprep.subr.mxu0 %v2204_v14 }
 0x31a   : > { %1772 = vmatpush3.msra.mxu0 %v2212_v16 }
 0x31b   : > { %1773 = vmatprep.subr.mxu0 %v2219_v18 }
 0x31c   : > { %1774 = vmatpush3.msra.mxu0 %v2225_v19 }
 0x31d   : > { %1775 = vmatprep.subr.mxu0 %v2232_v20 }
 0x31e   : > { %1776 = vmatpush3.msra.mxu0 %v2240_v22 }
 0x31f   : > { %1777 = vmatprep.subr.mxu0 %v2247_v24 }
 0x320   : > { %1778 = vmatpush3.msra.mxu0 %v2253_v25 }
 0x321   : > { %1779 = vmatprep.subr.mxu0 %v2260_v26 }
 0x322   : > { %1780 = vmatpush3.msra.mxu0 %v2268_v28 }
 0x323   : > { %1781 = vmatprep.subr.mxu0 %v2275_v30 }
 0x324   : > { %1782 = vmatpush3.msra.mxu0 %v2281_v31 }
 0x325   : > { %1783 = vmatprep.subr.mxu0 %v2288_v32 }
 0x326   : > { %1784 = vmatpush3.msra.mxu0 %v2296_v34 }
 0x327   : > { %1785 = vmatprep.subr.mxu0 %v2303_v36 }
 0x328   : > { %1786 = vmatpush3.msra.mxu0 %v2309_v37 }
 0x329   : > { %1787 = vmatprep.subr.mxu0 %v2316_v38  ;;  %v1273_v38 = vlaneseq }
 0x32a   : > { %1788 = vmatpush3.msra.mxu0 %v2324_v40 }
 0x32b   : > { %1789 = vmatprep.subr.mxu0 %v2378_v58 }
 0x32c   : > { %1790 = vmatpush3.msra.mxu0 %v2384_v59 }
 0x32d   : > { %1791 = vmatprep.subr.mxu0 %v2390_v60 }
 0x32e   : > { %1792 = vmatpush3.msra.mxu0 %v2396_v61 }
 0x32f   : > { %1793 = vmatprep.subr.mxu0 %v2402_v62 }
 0x330   : > { %1794 = vmatpush3.msra.mxu0 %v2408_v63 }
 0x331   : > { %1795 = vmatprep.subr.mxu0 %v2414_v0  ;;  %v1274_v0 = vshrl.u32 %v1273_v38, 7 }
 0x332   : > { %1796 = vmatpush3.msra.mxu0 %v2420_v1 }
 0x333   : > { %1797 = vmatprep.subr.mxu0 %v2426_v2  ;;  %v1275_v53 = vsub.s32 0, %v1274_v0 }
 0x334   : > { %1798 = vmatpush3.msra.mxu0 %v2432_v3 }
 0x3cd   : > { %v1142_v10 = vpop.f32.mrf.mxu1 }
 0x3ce   : > { %v1236_v13 = vmul.f32 %v1142_v10, %v2589_v6  ;;  %v1063_v10 = vadd.f32 %v1041_v4, %v1039_v49 }
 0x3cf   : > { %v1144_v11 = vpop.f32.mrf.mxu1 }
 0x3d0   : > { %v1237_v18 = vmul.f32 %v1144_v11, %v2586_v7 }
 0x3d1   : > { %v1148_v12 = vpop.f32.mrf.mxu1 }
 0x3d2   : > { %v1238_v14 = vmul.f32 %v1148_v12, %v2583_v29  ;;  %v1276_v29 = vrot.slane %v439_v5, %v1275_v53 }
 0x3d3   : > { %v1150_v16 = vpop.f32.mrf.mxu1 }
 0x3d4   : > { %v1244_v19 = vadd.f32 %v1238_v14, %v1236_v13  ;;  %v1239_v20 = vmul.f32 %v1150_v16, %v2581_v33  ;;  %v1049_v14 = vadd.f32 %v1037_v21, %v1035_v50  ;;  %v1057_v16 = vrot.slane %v1056_v41, 4 }
 0x3d5   : > { %v1225_v22 = vpop.f32.mrf.mxu0 }
 0x3d6   : > { %v1245_v24 = vrot.slane %v1244_v19, 4  ;;  %v1251_v25 = vadd.f32 %v1239_v20, %v1237_v18  ;;  %v1240_v34 = vmul.f32 %v1225_v22, %v2610_v15  ;;  %v1064_v22 = vrot.slane %v1063_v10, 4 }
 0x3d7   : > { %v1227_v26 = vpop.f32.mrf.mxu0 }
 0x3d8   : > { %v1246_v28 = vadd.f32 %v1245_v24, %v1244_v19  ;;  %v1252_v30 = vrot.slane %v1251_v25, 4  ;;  %v1241_v58 = vmul.f32 %v1227_v26, %v2607_v47  ;;  %v1058_v26 = vadd.f32 %v1057_v16, %v1056_v41 }
 0x3d9   : > { %v1231_v31 = vpop.f32.mrf.mxu0 }
 0x3da   : > { %v1253_v32 = vadd.f32 %v1252_v30, %v1251_v25  ;;  %v1242_v36 = vmul.f32 %v1231_v31, %v2603_v43  ;;  %v1247_v40 = vrot.slane %v1246_v28, 2  ;;  %v1279_v43 = vsub.s32 1, %v1274_v0 }
 0x3db   : > { %v1233_v37 = vpop.f32.mrf.mxu0  ;;  %v1050_v25 = vrot.slane %v1049_v14, 4 }
 0x3dc   : > { %v1258_v59 = vadd.f32 %v1242_v36, %v1240_v34  ;;  %v1243_v60 = vmul.f32 %v1233_v37, %v2601_v48  ;;  %v1254_v61 = vrot.slane %v1253_v32, 2  ;;  %v1248_v1 = vadd.f32 %v1247_v40, %v1246_v28  ;;  %v2771_v48 = vld [vmem:[#allocation8_spill] sm:$0xff] }
 0x3dd   : > { %v1034_v15 = vmul.f32 %v2589_v6, %v2771_v48  ;;  %v1280_v33 = vrot.slane %v439_v5, %v1279_v43  ;;  %v1051_v36 = vadd.f32 %v1050_v25, %v1049_v14  ;;  %v1059_v37 = vrot.slane %v1058_v26, 2 }
 0x3de   : > { %v1259_v62 = vrot.slane %v1258_v59, 4  ;;  %v1265_v63 = vadd.f32 %v1243_v60, %v1241_v58  ;;  %v1255_v52 = vadd.f32 %v1254_v61, %v1253_v32  ;;  %v1249_v8 = vrot.slane %v1248_v1, 1 }
 0x3df   : > { %v1042_v18 = vadd.f32 %v1036_v46, %v1034_v15  ;;  %v1065_v32 = vadd.f32 %v1064_v22, %v1063_v10  ;;  %v1052_v58 = vrot.slane %v1051_v36, 2 }
 0x3e0   : > { %v1260_v2 = vadd.f32 %v1259_v62, %v1258_v59  ;;  %v1266_v3 = vrot.slane %v1265_v63, 4  ;;  %v1256_v47 = vrot.slane %v1255_v52, 1  ;;  %v1250_v11 = vadd.f32 %v1249_v8, %v1248_v1 }
 0x3e1   : > { %v1043_v31 = vrot.slane %v1042_v18, 4  ;;  %v1066_v40 = vrot.slane %v1065_v32, 2  ;;  %v1060_v59 = vadd.f32 %v1059_v37, %v1058_v26  ;;  %v1053_v62 = vadd.f32 %v1052_v58, %v1051_v36 }
 0x3e2   : > { %v1261_v27 = vrot.slane %v1260_v2, 2  ;;  %v1267_v45 = vadd.f32 %v1266_v3, %v1265_v63  ;;  %v1257_v19 = vadd.f32 %v1256_v47, %v1255_v52 }
 0x3e3   : > { %v1044_v38 = vadd.f32 %v1043_v31, %v1042_v18  ;;  %v1067_v61 = vadd.f32 %v1066_v40, %v1065_v32  ;;  %v1061_v63 = vrot.slane %v1060_v59, 1  ;;  %v1054_v3 = vrot.slane %v1053_v62, 1 }
 0x3e4   : > { %v1262_v55 = vadd.f32 %v1261_v27, %v1260_v2  ;;  %v1268_v56 = vrot.slane %v1267_v45, 2 }
 0x3e5   : > { %v1045_v60 = vrot.slane %v1044_v38, 2  ;;  %v1068_v1 = vrot.slane %v1067_v61, 1  ;;  %v1062_v54 = vadd.f32 %v1061_v63, %v1060_v59  ;;  %v1055_v4 = vadd.f32 %v1054_v3, %v1053_v62 }
 0x3e6   : > { %v1263_v23 = vrot.slane %v1262_v55, 1  ;;  %v1269_v17 = vadd.f32 %v1268_v56, %v1267_v45 }
 0x3e7   : > { %v1046_v0 = vadd.f32 %v1045_v60, %v1044_v38  ;;  %v1069_v27 = vadd.f32 %v1068_v1, %v1067_v61 }
 0x3e8   : > { %v1264_v12 = vadd.f32 %v1263_v23, %v1262_v55  ;;  %v1270_v13 = vrot.slane %v1269_v17, 1 }
 0x3e9   : > { %v1047_v52 = vrot.slane %v1046_v0, 1 }
 0x3ea   : > { %v1271_v7 = vadd.f32 %v1270_v13, %v1269_v17  ;;  %v1288_v20 = vsel %vm1287_vm2, %v1264_v12, %v1250_v11 }
 0x3eb   : > { %v1292_v24 = vmul.f32 %v1288_v20, %v1276_v29  ;;  %v1048_v49 = vadd.f32 %v1047_v52, %v1046_v0 }
 0x3ec   : > { %v1289_v6 = vsel %vm1287_vm2, %v1271_v7, %v1257_v19 }
 0x3ed   : > { %v1293_v28 = vmul.f32 %v1289_v6, %v1280_v33  ;;  %v1294_v30 = vmax.f32 %v1292_v24, 1e-16 }
 0x3ef   : > { %v1295_v34 = vmax.f32 %v1293_v28, 1e-16  ;;  %1907 = vrsqrt.f32 %v1294_v30 }
 0x3f1   : > { %1909 = vrsqrt.f32 %v1295_v34 }
 0x3fc   : > { %v1908_v2 = vpop.eup %1907 }
 0x3fd   : > { %v1300_v57 = vrot.slane %v1908_v2, 1  ;;  %v1306_v8 = vmul.f32 %v1908_v2, %v1048_v49 }
 0x3fe   : > { %v1910_v39 = vpop.eup %1909 }
 0x3ff   : > { %v1301_v45 = vrot.slane %v1910_v39, 1  ;;  %v1308_v35 = vmul.f32 %v1300_v57, %v1062_v54  ;;  %v1307_v51 = vmul.f32 %v1910_v39, %v1055_v4 }
 0x401   : > { %v1309_v44 = vmul.f32 %v1301_v45, %v1069_v27  ;;  %v1314_v53 = vrot.slane %v1308_v35, 7 }
 0x403   : > { %v1316_v46 = vrot.slane %v1309_v44, 7  ;;  %v1315_v56 = vsel %vm1287_vm2, %v1314_v53, %v1306_v8 }
 0x405   : > { %v1317_v55 = vsel %vm1287_vm2, %v1316_v46, %v1307_v51 }
 0x406   : > { %1384 = vmatprep.mubr.f32.mxu0 %v1317_v55 }
 0x407   : > { %1385 = vmatmul.mubr.f32.vlgmr.msra.gmra.mxu0 %v1315_v56 }
 0x4c7   : > { %v1799_v5 = vpop.f32.mrf.mxu0 }
 0x4c9   : > { %v1800_v21 = vpop.f32.mrf.mxu0 }
 0x4ca   : > { %v1801_v42 = vadd.f32 %v1800_v21, %v1799_v5 }
 0x4cc   : > { %v1396_v50 = vmul.f32 %v1801_v42, %v1636_v9 }
 0x4ce   : > { %1398 = vst.msk [vmem:[%s344_s20] sm:$0x3] %vm1397_vm3, %v1396_v50 }
 0x4cf   : > { %1952 = shalt.err (!%p1949_p7)
}
 0x4d0   : > { %s1953_s17 = scalar_lea.hbm %s1413_s14, 32  ;;  %s1957_s18 = scalar_lea.hbm %s2742_s6, 64 }
 0x4d1   : > { %p1954_p10 = scmp.ne.s32.totalorder %s1413_s14, %s1953_s17  ;;  %p1958_p2 = scmp.lt.s32.totalorder %s1413_s14, %s2742_s6 }
 0x4d2   : > { %p1959_p8 = scmp.lt.s32.totalorder %s1957_s18, %s1953_s17 }
 0x4d3   : > { %p1955_p4 = pnand %p1954_p10, %p2112_p9 }
 0x4d4   : > { %p1960_p12 = por %p1959_p8, %p1958_p2 }
 0x4d5   : > { %p1956_p13 = pneg %p1955_p4 }
 0x4d7   : > { %p1961_p0 = pnand %p1960_p12, %p1956_p13 }
 0x4d9   : > { %1964 = shalt.err (!%p1961_p0)
}
 0x4da   : > { %1804 = dma.vmem_to_hbm [thread:$0]  (%p2112_p9), %s1416_s27, 32, %s1413_s14, %s1400_s7  }
 0x4db PF: > { %s1427_s28 = sand.u32 1, %s1999_s21   ;;  %p2772_p1 = scmp.ge.s32.totalorder %s2019_s26, 2 }
 0x4dc   : > { %s1428_s16 = scalar_lea.sflag [#allocation4], %s1427_s28 }
 0x4dd   : > { %p1811_p3 = pnand %p2772_p1, %p2119_p11 }
 0x4df   : > { %p1812_p5 = pneg %p1811_p3 }
 0x4e1   : > { %1994 = dma.done.wait (%p1812_p5), %s1428_s16, 32  }
 0x4e2   : > { %1996 = vsyncadd (%p1812_p5), %s1428_s16, 4294967264  ;;  %s22_s26 = sadd.s32 1, %s2019_s26   ;;  %s2773_s21 = smov %s2003_s22 }
 0x4e3   : > { %p19_p6 = scmp.ge.s32.totalorder %s22_s26, 4   ;;  %s2774_s22 = smov %s2007_s23 }
 0x4e4   : > { %s2775_s23 = smov %s2117_s11  ;;  %s2776_s24 = smov %s2015_s25 }
 0x4e5   : > { %s2777_s25 = smov %s2779_s29  ;;  %21 = sbr.rel (!%p19_p6) target bundleno = 6 (0x6), region = 101 }
 0x4ea   :  { %1433 = vsyncpa [#allocation3], 1 }
 0x4eb   :  { %1435 = vsyncpa [#allocation3 + $0x1], 1 }
 0x4ec   :  { %1436 = vsyncpa [#allocation4], 1 }
 0x4ed   :  { %1438 = vsyncpa [#allocation4 + $0x1], 1 }

</bundles_post_ra>
